<compile_context>
chip_gen: v7x
topology: tpu7x:2x2x1
jax: 0.10.0
libtpu: 0.0.40
codegen_flags: <defaults>
</compile_context>

<pallas_src>
import functools

import jax
import jax.numpy as jnp
from jax import lax
from jax.experimental import pallas as pl
from jax.experimental.pallas import tpu as pltpu

LANES = 128
SUBLANES = 8
MAX_TILE_ROWS = 8192                  # (8192,128) f32 = 4 MiB per input block
MAX_ACCS = 8                          # independent (8,128) accumulators / tile
VMEM_LIMIT_BYTES = 48 * 1024 * 1024   # fits v5e/v6e (128 MiB) and v7x (64 MiB)


def _round_up(x, m):
    return ((x + m - 1) // m) * m


def _sq_diff_kernel(p_ref, r_ref, o_ref, *, tile_rows, tiles_per_par,
                    rows_total, needs_mask, accs):
    """Accumulate sum((real-pred)**2) of one tile into a resident (8,128) acc."""
    i = pl.program_id(0)   # parallel slice (one per TensorCore on v7x megacore)
    k = pl.program_id(1)   # sequential tile within the slice (reduction axis)

    @pl.when(k == 0)
    def _():
        o_ref[...] = jnp.zeros_like(o_ref)

    p = p_ref[...]
    r = r_ref[...]
    if p.dtype != jnp.float32:  # no dead casts when inputs are already f32
        p = p.astype(jnp.float32)
        r = r.astype(jnp.float32)
    d = r - p
    sq = d * d

    def partial_sum(x):
        # (tile_rows,128) -> (g, accs, 8, 128) -> (accs, 8, 128) -> (8, 128).
        # The split only groups whole (8,128) tiles, so the reshape is free;
        # `accs` independent accumulation chains give the 4 VALUs ILP instead
        # of one serial chain of tile_rows//8 dependent vadds.
        g = tile_rows // (accs * SUBLANES)
        s = jnp.sum(x.reshape(g, accs, SUBLANES, LANES), axis=0)
        return jnp.sum(s, axis=0)

    if needs_mask:
        # Only the *global* last tile can overhang rows_total (guaranteed by
        # the tiling math in _sum_sq_diff_main); gate the iota+compare+select
        # to that single step so all other steps take the unmasked fast path.
        is_last = jnp.logical_and(i == pl.num_programs(0) - 1,
                                  k == pl.num_programs(1) - 1)

        @pl.when(is_last)
        def _():
            row0 = (i * tiles_per_par + k) * tile_rows
            row_ids = row0 + lax.broadcasted_iota(
                jnp.int32, (tile_rows, LANES), 0)
            masked = jnp.where(row_ids < rows_total, sq, jnp.float32(0.0))
            o_ref[...] += partial_sum(masked)

        @pl.when(jnp.logical_not(is_last))
        def _():
            o_ref[...] += partial_sum(sq)
    else:
        o_ref[...] += partial_sum(sq)


def _sum_sq_diff_main(p2, r2, rows_total):
    """Sum of squared differences over a (rows_total, 128) view via Pallas."""
    assert rows_total < 2 ** 31  # int32 row ids in-kernel

    # --- tiling / load balancing -------------------------------------------
    # Two parallel slices (when there is enough work) so the v7x megacore can
    # shard the grid across both TensorCores; per-slice rows are balanced and
    # rounded to a sublane multiple, individual tiles capped at 4 MiB.
    num_par = 2 if rows_total >= 2 * SUBLANES else 1
    rows_per_par = _round_up(pl.cdiv(rows_total, num_par), SUBLANES)
    tiles_per_par = pl.cdiv(rows_per_par, MAX_TILE_ROWS)
    tile_rows = min(
        MAX_TILE_ROWS,
        _round_up(pl.cdiv(rows_per_par, tiles_per_par), SUBLANES),
    )
    # By construction only the global last tile may overhang rows_total.
    needs_mask = (num_par * tiles_per_par * tile_rows) != rows_total

    accs = MAX_ACCS
    while tile_rows % (accs * SUBLANES) != 0:
        accs //= 2

    kernel = functools.partial(
        _sq_diff_kernel,
        tile_rows=tile_rows,
        tiles_per_par=tiles_per_par,
        rows_total=rows_total,
        needs_mask=needs_mask,
        accs=accs,
    )

    partials = pl.pallas_call(
        kernel,
        out_shape=jax.ShapeDtypeStruct((num_par * SUBLANES, LANES), jnp.float32),
        grid=(num_par, tiles_per_par),
        in_specs=[
            pl.BlockSpec((tile_rows, LANES),
                         lambda i, k: (i * tiles_per_par + k, 0)),
            pl.BlockSpec((tile_rows, LANES),
                         lambda i, k: (i * tiles_per_par + k, 0)),
        ],
        out_specs=pl.BlockSpec((SUBLANES, LANES), lambda i, k: (i, 0)),
        compiler_params=pltpu.CompilerParams(
            dimension_semantics=("parallel", "arbitrary"),
            vmem_limit_bytes=VMEM_LIMIT_BYTES,
        ),
    )(p2, r2)

    # Single tiny cross-lane/sublane reduction over (num_par*8, 128) partials.
    return jnp.sum(partials)


def mse(pred, real):
    """Pallas MSE matching torch: sum((real - pred)**2) / numel."""
    assert pred.shape == real.shape
    n = pred.size  # numel (static)
    if n == 0:
        return jnp.float32(0.0)

    p = jnp.ravel(pred)
    r = jnp.ravel(real)

    rows_total = n // LANES
    n_main = rows_total * LANES  # elements covered by the kernel

    total = jnp.float32(0.0)
    if rows_total > 0:
        if n_main == n:
            # Zero-copy view: ravel + reshape are bitcasts, no HBM copy.
            p2 = p.reshape(rows_total, LANES)
            r2 = r.reshape(rows_total, LANES)
        else:
            # Non-128-divisible numel: a slice feeding pallas_call can't fuse
            # into the custom call, so XLA materializes a copy of both inputs.
            # TODO(synk): handle the sub-128 tail in-kernel to avoid this copy.
            p2 = p[:n_main].reshape(rows_total, LANES)
            r2 = r[:n_main].reshape(rows_total, LANES)
        total = total + _sum_sq_diff_main(p2, r2, rows_total)

    if n_main < n:
        # Sub-128-element remainder: trivial plain-JAX sum (tiny slice only).
        dt = (r[n_main:] - p[n_main:]).astype(jnp.float32)
        total = total + jnp.sum(dt * dt)

    return (total / jnp.float32(n)).astype(jnp.float32)


if __name__ == "__main__":
    key = jax.random.PRNGKey(0)

    def _check(shape):
        k1, k2 = jax.random.split(jax.random.fold_in(key, hash(shape) % 1000))
        pred = jax.random.normal(k1, shape, dtype=jnp.float32)
        real = jax.random.normal(k2, shape, dtype=jnp.float32)
        out = mse(pred, real)
        jax.block_until_ready(out)
        ref = jnp.sum((real - pred) ** 2) / pred.size
        assert jnp.allclose(out, ref, rtol=1e-5, atol=1e-5), (shape, out, ref)

    # Primary small NCHW-like shape consistent with typical usage of this loss
    # (numel % 128 == 0 -> zero-copy fast path, 2 parallel slices, no mask).
    _check((2, 4, 16, 16))
    # Ragged-rows case (numel % 128 == 0 but rows not tile-divisible -> mask).
    _check((2, 4, 16, 17))
    # Non-128-divisible numel (fallback slice path + plain-JAX tail).
    _check((3, 5, 7, 11))

    print("KERNEL_OK")
</pallas_src>

<mosaic_0001>
module attributes {stable_mosaic.version = 11 : i64} {
  func.func @_sq_diff_kernel(%arg0: i32, %arg1: i32, %arg2: memref<8x128xf32, #tpu.memory_space<vmem>>, %arg3: memref<8x128xf32, #tpu.memory_space<vmem>>, %arg4: memref<8x128xf32, #tpu.memory_space<vmem>>) attributes {dimension_semantics = [#tpu.dimension_semantics<parallel>, #tpu.dimension_semantics<arbitrary>], iteration_bounds = array<i64: 2, 1>, scalar_prefetch = 0 : i64, scratch_operands = 0 : i64, tpu.core_type = #tpu.core_type<tc>, window_params = [{transform_indices = @transform_0, window_bounds = array<i64: 8, 128>}, {transform_indices = @transform_1, window_bounds = array<i64: 8, 128>}, {transform_indices = @transform_2, window_bounds = array<i64: 8, 128>}]} {
    %c0_i32 = arith.constant 0 : i32
    %0 = arith.cmpi eq, %arg1, %c0_i32 : i32
    %1 = arith.extui %0 : i1 to i32
    %c0_i32_0 = arith.constant 0 : i32
    %2 = arith.cmpi ne, %1, %c0_i32_0 : i32
    scf.if %2 {
      %cst_9 = arith.constant 0.000000e+00 : f32
      %13 = vector.broadcast %cst_9 : f32 to vector<8x128xf32>
      %c0_10 = arith.constant 0 : index
      %c0_11 = arith.constant 0 : index
      %14 = vector.load %arg4[%c0_10, %c0_11] : memref<8x128xf32, #tpu.memory_space<vmem>>, vector<8x128xf32>
      tpu.vector_store %arg4[%c0_10, %c0_11], %13 {strides = array<i32>} : memref<8x128xf32, #tpu.memory_space<vmem>>, vector<8x128xf32>,
    } else {
    }
    %c0 = arith.constant 0 : index
    %c0_1 = arith.constant 0 : index
    %3 = vector.load %arg2[%c0, %c0_1] : memref<8x128xf32, #tpu.memory_space<vmem>>, vector<8x128xf32>
    %c0_2 = arith.constant 0 : index
    %c0_3 = arith.constant 0 : index
    %4 = vector.load %arg3[%c0_2, %c0_3] : memref<8x128xf32, #tpu.memory_space<vmem>>, vector<8x128xf32>
    %5 = arith.subf %4, %3 : vector<8x128xf32>
    %6 = arith.mulf %5, %5 : vector<8x128xf32>
    %c0_4 = arith.constant 0 : index
    %c0_5 = arith.constant 0 : index
    %7 = vector.load %arg4[%c0_4, %c0_5] : memref<8x128xf32, #tpu.memory_space<vmem>>, vector<8x128xf32>
    %8 = vector.shape_cast %6 : vector<8x128xf32> to vector<1x1x8x128xf32>
    %cst = arith.constant dense<0.000000e+00> : vector<1x8x128xf32>
    %9 = vector.multi_reduction <add>, %8, %cst [0] : vector<1x1x8x128xf32> to vector<1x8x128xf32>
    %cst_6 = arith.constant dense<0.000000e+00> : vector<8x128xf32>
    %10 = vector.multi_reduction <add>, %9, %cst_6 [0] : vector<1x8x128xf32> to vector<8x128xf32>
    %11 = arith.addf %7, %10 : vector<8x128xf32>
    %c0_7 = arith.constant 0 : index
    %c0_8 = arith.constant 0 : index
    %12 = vector.load %arg4[%c0_7, %c0_8] : memref<8x128xf32, #tpu.memory_space<vmem>>, vector<8x128xf32>
    tpu.vector_store %arg4[%c0_7, %c0_8], %11 {strides = array<i32>} : memref<8x128xf32, #tpu.memory_space<vmem>>, vector<8x128xf32>,
    return
  }
  func.func @transform_0(%arg0: i32, %arg1: i32) -> (i32, i32) {
    %c1_i32 = arith.constant 1 : i32
    %0 = arith.muli %arg0, %c1_i32 : i32
    %1 = arith.addi %0, %arg1 : i32
    %c0_i32 = arith.constant 0 : i32
    %c0_i32_0 = arith.constant 0 : i32
    return %1, %c0_i32 : i32, i32
  }
  func.func @transform_1(%arg0: i32, %arg1: i32) -> (i32, i32) {
    %c1_i32 = arith.constant 1 : i32
    %0 = arith.muli %arg0, %c1_i32 : i32
    %1 = arith.addi %0, %arg1 : i32
    %c0_i32 = arith.constant 0 : i32
    %c0_i32_0 = arith.constant 0 : i32
    return %1, %c0_i32 : i32, i32
  }
  func.func @transform_2(%arg0: i32, %arg1: i32) -> (i32, i32) {
    %c0_i32 = arith.constant 0 : i32
    %c0_i32_0 = arith.constant 0 : i32
    return %arg0, %c0_i32 : i32, i32
  }
}

</mosaic_0001>

<bundles_post_ra>
// kernel: tpu_custom_call.1
= control target key start
LH: loop header
LB: loop body
LE: loop exit
PB: predicated region body
PF: predicated region fallthrough
CT: control target
= control target key end

     0   :  { %7 = vsyncpa [#allocation3], 0  ;;  %s817_s0 = inlined_call_operand.hbm [shape: f32[16,128], index: 0, kind: input, shape index: {}]   ;;  %s818_s1 = inlined_call_operand.hbm [shape: f32[16,128], index: 1, kind: input, shape index: {}]   ;;  %s819_s2 = inlined_call_operand.hbm [shape: f32[16,128], index: 2, kind: output, shape index: {}]  }
   0x1   :  { %9 = vsyncpa [#allocation3 + $0x1], 0 }
   0x2   :  { %10 = vsyncpa [#allocation6], 0 }
   0x3   :  { %12 = vsyncpa [#allocation6 + $0x1], 0 }
   0x4   :  { %13 = vsyncpa [#allocation4], 0 }
   0x5   :  { %15 = vsyncpa [#allocation4 + $0x1], 0  ;;  %s597_s9 = smov 0   ;;  %s599_s10 = smov 0  }
   0x6   :  { %s601_s11 = smov 0   ;;  %s603_s12 = smov 0  }
   0x7   :  { %s605_s13 = smov 0   ;;  %s607_s14 = smov 0  }
   0x8 LB: > { %s347_s15 = sadd.s32 4294967295, %s577_s14   ;;  %s348_s16 = sadd.s32 4294967294, %s577_s14   ;;  %s577_s14 = sphi %s607_s14, %s21_s14   ;;  %s573_s13 = sphi %s605_s13, %s839_s13   ;;  %s569_s12 = sphi %s603_s12, %s838_s12   ;;  %s565_s11 = sphi %s601_s11, %s837_s11   ;;  %s561_s10 = sphi %s599_s10, %s836_s10   ;;  %s557_s9 = sphi %s597_s9, %s835_s9  }
   0x9   : > { %s33_s17 = sadd.s32 1, %s573_s13  ;;  %s42_s18 = sadd.s32 1, %s565_s11 }
   0xa   : > { %p35_p0 = scmp.ge.s32.totalorder %s33_s17, 2  ;;  %p49_p1 = scmp.ne.s32.totalorder %s565_s11, %s561_s10 }
   0xb   : > { %p50_p2 = scmp.eq.s32.totalorder %s577_s14, 0  ;;  %p55_p3 = scmp.ne.s32.totalorder %s561_s10, %s557_s9 }
   0xc   : > { %s841_s17 = smov (%p35_p0, %s33_s17), 0  ;;  %p56_p5 = scmp.eq.s32.totalorder %s347_s15, 0 }
   0xd   : > { %p638_p4 = por %p50_p2, %p49_p1  ;;  %s39_s20 = ssub.s32 %s573_s13, %s841_s17 }
   0xe   : > { %p107_p6 = scmp.eq.s32.totalorder %s347_s15, 1  ;;  %p40_p7 = scmp.eq.s32.totalorder %s39_s20, 0 }
   0xf   : > { %p644_p8 = por %p56_p5, %p55_p3  ;;  %p113_p10 = scmp.eq.s32.totalorder %s348_s16, 1 }
  0x10   : > { %p648_p9 = por %p107_p6, %p49_p1  ;;  %p380_p13 = scmp.lt.s32.totalorder %s577_s14, 2 }
  0x11   : > { %s823_s21 = scalar_select %p644_p8, 1, 0 }
  0x12   : > { %s824_s22 = scalar_select %p648_p9, 1, 0 }
  0x13   : > { %s653_s23 = scalar_select %p40_p7, %s565_s11, %s42_s18  }
  0x14   : > { %p655_p11 = por %p113_p10, %p55_p3  ;;  %s662_s25 = sand.u32 1, %s565_s11  }
  0x15   : > { %s351_s26 = sshll.u32 %s662_s25, 3  ;;  %s352_s27 = sshll.u32 %s573_s13, 7 }
  0x16   : > { %s825_s24 = scalar_select %p655_p11, 1, 0 }
  0x17   : > { %s671_s30 = scalar_lea.hbm %s817_s0, %s352_s27  ;;  %s137_s3 = scalar_lea.vmem [#allocation2], %s351_s26 }
  0x18   : > { %s145_s4 = sshll.u32 %s137_s3, 4  ;;  %p679_p0 = pnand %p380_p13, %p638_p4  ;;  %s675_s4 = int_to_ptr.vmem [resolvable:$true] %s145_s4 }
  0x19   : > { %s134_s6 = scalar_lea.sflag [#allocation3], %s662_s25  ;;  %s431_s7 = scalar_lea.hbm %s671_s30, 128 }
  0x1a   : > { %p432_p3 = scmp.ne.s32.totalorder %s671_s30, %s431_s7  ;;  %p433_p5 = pneg %p679_p0 }
  0x1b   : > { %s436_s16 = scalar_lea.hbm %s817_s0, 256  ;;  %p437_p4 = scmp.lt.u32.totalorder %s671_s30, %s817_s0 }
  0x1c   : > { %p434_p6 = pnand %p433_p5, %p432_p3  ;;  %p438_p10 = scmp.lt.u32.totalorder %s436_s16, %s431_s7 }
  0x1d   : > { %p440_p12 = scmp.lt.u32.totalorder %s431_s7, %s671_s30 }
  0x1e   : > { %p435_p7 = pneg %p434_p6  ;;  %p439_p13 = por %p438_p10, %p437_p4 }
  0x20   : > { %p441_p1 = por %p440_p12, %p439_p13 }
  0x22   : > { %p442_p2 = pnand %p441_p1, %p435_p7 }
  0x24   : > { %445 = shalt.err (!%p442_p2)
}
  0x25   : > { %s446_s20 = scalar_lea.vmem %s675_s4, 128  ;;  %s579_s28 = smov [#allocation2]  }
  0x26   : > { %p447_p3 = scmp.ne.s32.totalorder %s675_s4, %s446_s20  ;;  %s451_s29 = sshll.u32 %s579_s28, 4  ;;  %s452_s29 = int_to_ptr.vmem [resolvable:$false] %s451_s29 }
  0x27   : > { %s453_s3 = scalar_lea.vmem %s452_s29, 256  ;;  %p454_p9 = scmp.lt.s32.totalorder %s675_s4, %s452_s29 }
  0x28   : > { %p449_p6 = pnand %p447_p3, %p433_p5  ;;  %p455_p4 = scmp.lt.s32.totalorder %s453_s3, %s446_s20 }
  0x2a   : > { %p450_p11 = pneg %p449_p6  ;;  %p456_p10 = por %p455_p4, %p454_p9 }
  0x2c   : > { %p457_p12 = pnand %p456_p10, %p450_p11 }
  0x2e   : > { %460 = shalt.err (!%p457_p12)
}
  0x2f   : > { %372 = dma.hbm_to_vmem [thread:$0]  (!%p679_p0), %s671_s30, 128, %s675_s4, %s134_s6  }
  0x30   : > { %p827_p1 = scmp.lt.s32.totalorder %s577_s14, 3  ;;  %p828_p2 = scmp.ge.s32.totalorder %s577_s14, 1 }
  0x31   : > { %s724_s16 = scalar_lea.hbm %s818_s1, %s352_s27  ;;  %s156_s18 = scalar_lea.vmem [#allocation5], %s351_s26 }
  0x32   : > { %p715_p7 = pnand %p828_p2, %p827_p1  ;;  %s164_s19 = sshll.u32 %s156_s18, 4  ;;  %s165_s19 = int_to_ptr.vmem [resolvable:$true] %s164_s19 }
  0x33   : > { %s153_s30 = scalar_lea.sflag [#allocation6], %s662_s25  ;;  %s461_s4 = scalar_lea.hbm %s724_s16, 128 }
  0x34   : > { %s829_s7 = scalar_select %p715_p7, 1, 0 }
  0x35   : > { %p462_p9 = scmp.ne.s32.totalorder %s724_s16, %s461_s4  ;;  %s466_s27 = scalar_lea.hbm %s818_s1, 256 }
  0x36   : > { %p467_p3 = scmp.lt.u32.totalorder %s724_s16, %s818_s1  ;;  %p468_p6 = scmp.lt.u32.totalorder %s466_s27, %s461_s4 }
  0x37   : > { %p464_p11 = pnand %p462_p9, %p433_p5  ;;  %p470_p10 = scmp.lt.u32.totalorder %s461_s4, %s724_s16 }
  0x38   : > { %p469_p4 = por %p468_p6, %p467_p3 }
  0x39   : > { %p465_p13 = pneg %p464_p11 }
  0x3a   : > { %p471_p12 = por %p470_p10, %p469_p4 }
  0x3c   : > { %p472_p1 = pnand %p471_p12, %p465_p13 }
  0x3e   : > { %475 = shalt.err (!%p472_p1)
}
  0x3f   : > { %s476_s25 = scalar_lea.vmem %s165_s19, 128  ;;  %s580_s26 = smov [#allocation5]  }
  0x40   : > { %p477_p2 = scmp.ne.s32.totalorder %s165_s19, %s476_s25  ;;  %s481_s3 = sshll.u32 %s580_s26, 4  ;;  %s482_s3 = int_to_ptr.vmem [resolvable:$false] %s481_s3 }
  0x41   : > { %s483_s8 = scalar_lea.vmem %s482_s3, 256  ;;  %p484_p8 = scmp.lt.s32.totalorder %s165_s19, %s482_s3 }
  0x42   : > { %p479_p9 = pnand %p477_p2, %p433_p5  ;;  %p485_p7 = scmp.lt.s32.totalorder %s483_s8, %s476_s25 }
  0x44   : > { %p480_p11 = pneg %p479_p9  ;;  %p486_p3 = por %p485_p7, %p484_p8 }
  0x46   : > { %p487_p6 = pnand %p486_p3, %p480_p11 }
  0x48   : > { %490 = shalt.err (!%p487_p6)
}
  0x49   : > { %375 = dma.hbm_to_vmem [thread:$0]  (!%p679_p0), %s724_s16, 128, %s165_s19, %s153_s30  }
  0x4a   : > { %p830_p13 = scmp.ne.s32.totalorder %s829_s7, 0 }
  0x4b   : > { %s751_s15 = sand.u32 (!%p830_p13), 1, %s561_s10   ;;  %p831_p5 = scmp.ne.s32.totalorder (!%p830_p13), %s823_s21, 0 }
  0x4c   : > { %173 = sbr.rel (%p830_p13) target bundleno = 112 (0x70), region = 28  ;;  %s356_s18 = sshll.u32 (!%p830_p13), %s751_s15, 3 }
  0x4d   : > { %s176_s4 = scalar_lea.sflag (!%p830_p13), [#allocation3], %s751_s15  ;;  %s179_s6 = scalar_lea.vmem (!%p830_p13), [#allocation2], %s356_s18 }
  0x53   : > { %544 = dma.done.wait (%p831_p5), %s176_s4, 128  }
  0x54   : > { %546 = vsyncadd (%p831_p5), %s176_s4, 4294967168  ;;  %s185_s5 = scalar_lea.sflag [#allocation6], %s751_s15  ;;  %s188_s16 = scalar_lea.vmem [#allocation5], %s356_s18 }
  0x55   : > { %548 = dma.done.wait (%p831_p5), %s185_s5, 128  }
  0x56   : > { %550 = vsyncadd (%p831_p5), %s185_s5, 4294967168  ;;  %v221_v0 = vld [vmem:[%s179_s6] sm:$0xff]  ;;  %v222_v1 = vld [vmem:[%s188_s16] sm:$0xff]  ;;  %s360_s7 = sshll.u32 %s569_s12, 7  ;;  %s213_s19 = scalar_lea.vmem [#allocation7], %s356_s18 }
  0x57   : > { %v223_v2 = vsub.f32 %v222_v1, %v221_v0  ;;  %s244_s30 = sshll.u32 %s213_s19, 4  ;;  %s768_s28 = scalar_lea.hbm %s819_s2, %s360_s7  ;;  %s770_s30 = int_to_ptr.vmem [resolvable:$true] %s244_s30 }
  0x58   : > { %s231_s21 = scalar_lea.sflag [#allocation4], %s751_s15  ;;  %s491_s29 = scalar_lea.vmem %s770_s30, 128 }
  0x59   : > { %v224_v3 = vmul.f32 %v223_v2, %v223_v2  ;;  %p492_p8 = scmp.ne.s32.totalorder %s770_s30, %s491_s29  ;;  %p832_p0 = scmp.ne.s32.totalorder %s824_s22, 0 }
  0x5a   : > { %s581_s12 = smov [#allocation7]  }
  0x5b   : > { %229 = vst [vmem:[%s213_s19] sm:$0xff] %v224_v3  ;;  %p493_p7 = pnand %p492_p8, %p832_p0  ;;  %s495_s25 = sshll.u32 %s581_s12, 4  ;;  %s496_s25 = int_to_ptr.vmem [resolvable:$false] %s495_s25 }
  0x5c   : > { %s497_s26 = scalar_lea.vmem %s496_s25, 256  ;;  %p498_p10 = scmp.lt.s32.totalorder %s770_s30, %s496_s25 }
  0x5d   : > { %p494_p4 = pneg %p493_p7  ;;  %p499_p12 = scmp.lt.s32.totalorder %s497_s26, %s491_s29 }
  0x5f   : > { %p500_p1 = por %p499_p12, %p498_p10 }
  0x61   : > { %p501_p2 = pnand %p500_p1, %p494_p4 }
  0x63   : > { %504 = shalt.err (!%p501_p2)
}
  0x64   : > { %s505_s3 = scalar_lea.hbm %s768_s28, 128  ;;  %s509_s18 = scalar_lea.hbm %s819_s2, 256 }
  0x65   : > { %p506_p9 = scmp.ne.s32.totalorder %s768_s28, %s505_s3  ;;  %p510_p6 = scmp.lt.u32.totalorder %s768_s28, %s819_s2 }
  0x66   : > { %p511_p13 = scmp.lt.u32.totalorder %s509_s18, %s505_s3  ;;  %p513_p8 = scmp.lt.u32.totalorder %s505_s3, %s768_s28 }
  0x67   : > { %p507_p11 = pnand %p506_p9, %p832_p0 }
  0x68   : > { %p512_p5 = por %p511_p13, %p510_p6 }
  0x69   : > { %p508_p3 = pneg %p507_p11 }
  0x6a   : > { %p514_p7 = por %p513_p8, %p512_p5 }
  0x6c   : > { %p515_p4 = pnand %p514_p7, %p508_p3 }
  0x6e   : > { %518 = shalt.err (!%p515_p4)
}
  0x6f   : > { %367 = dma.vmem_to_hbm [thread:$0]  (%p832_p0), %s770_s30, 128, %s768_s28, %s231_s21  }
  0x70 PF: > { %s256_s5 = sand.u32 1, %s557_s9   ;;  %p833_p10 = scmp.ne.s32.totalorder %s825_s24, 0 }
  0x71   : > { %p834_p12 = scmp.ge.s32.totalorder %s577_s14, 2  ;;  %s257_s16 = scalar_lea.sflag [#allocation4], %s256_s5 }
  0x73   : > { %p377_p1 = pnand %p834_p12, %p833_p10 }
  0x75   : > { %552 = dma.done.wait (!%p377_p1), %s257_s16, 128  }
  0x76   : > { %554 = vsyncadd (!%p377_p1), %s257_s16, 4294967168  ;;  %s21_s14 = sadd.s32 1, %s577_s14   ;;  %s835_s9 = smov %s561_s10 }
  0x77   : > { %p18_p2 = scmp.ge.s32.totalorder %s21_s14, 4   ;;  %s836_s10 = smov %s565_s11 }
  0x78   : > { %s837_s11 = smov %s653_s23  ;;  %s838_s12 = smov %s573_s13 }
  0x79   : > { %s839_s13 = smov %s841_s17  ;;  %20 = sbr.rel (!%p18_p2) target bundleno = 8 (0x8), region = 90 }
  0x80   :  { %262 = vsyncpa [#allocation3], 1 }
  0x81   :  { %264 = vsyncpa [#allocation3 + $0x1], 1 }
  0x82   :  { %265 = vsyncpa [#allocation6], 1 }
  0x83   :  { %267 = vsyncpa [#allocation6 + $0x1], 1 }
  0x84   :  { %268 = vsyncpa [#allocation4], 1 }
  0x85   :  { %270 = vsyncpa [#allocation4 + $0x1], 1 }

</bundles_post_ra>
